<compile_context>
chip_gen: v7x
topology: tpu7x:2x2x1
jax: 0.10.0
libtpu: 0.0.40
codegen_flags: <defaults>
</compile_context>

<pallas_src>
import functools
import math

import jax
import jax.numpy as jnp
from jax.experimental import pallas as pl
from jax.experimental.pallas import tpu as pltpu


def _round_up(x: int, m: int) -> int:
    return ((x + m - 1) // m) * m


def _hadamard_matrix(n: int) -> jnp.ndarray:
    """Sylvester-construction Hadamard matrix (n must be a power of 2)."""
    h = jnp.ones((1, 1), dtype=jnp.float32)
    while h.shape[0] < n:
        h = jnp.block([[h, h], [h, -h]])
    return h


def prepare_hadamard_weight(proj: jnp.ndarray,
                            in_channels: int,
                            out_channels: int) -> jnp.ndarray:
    """Hoisted (once-per-model) weight prep: slice, transpose, zero-pad the
    output dim up to a multiple of 128 (lane-dense stores), cast to bf16
    (+/-1 and 0 are exact in bf16 -> no accuracy loss, half the HBM/VMEM)."""
    c_out_p = _round_up(out_channels, 128)
    w = proj[:out_channels, :in_channels].astype(jnp.float32).T  # (C_in, C_out)
    w = jnp.pad(w, ((0, 0), (0, c_out_p - out_channels)))        # zero columns
    return w.astype(jnp.bfloat16)


def _hadamard_classifier_kernel(s_ref, x_ref, w_ref, o_ref):
    # s_ref: SMEM (1,) f32   fused scalar  -scale / (||x||_F + eps)
    # x_ref: VMEM (blk, C_in) f32          batch tile of raw input
    # w_ref: VMEM (C_in, C_out_pad) bf16   resident +/-1 weight (padded, exact)
    # o_ref: VMEM (blk, C_out_pad) f32     lane-dense output tile
    out = jnp.dot(x_ref[...],
                  w_ref[...].astype(jnp.float32),
                  preferred_element_type=jnp.float32)
    o_ref[...] = s_ref[0] * out


def hadamard_classifier(x: jnp.ndarray,
                        w_padded: jnp.ndarray,
                        scale: jnp.ndarray,
                        *,
                        out_channels: int,
                        block_b: int = 512,
                        eps: float = 1e-8) -> jnp.ndarray:
    """x: (B, C_in) f32; w_padded: (C_in, round_up(C_out,128)) bf16 from
    prepare_hadamard_weight; scale: scalar f32. Returns (B, C_out) f32."""
    b, c_in = x.shape
    c_in_w, c_out_p = w_padded.shape
    assert c_in_w == c_in

    # Global Frobenius norm over the WHOLE input (tiny XLA reduce), fused with
    # -scale into a single post-matmul scalar.  Keeping this outside the grid
    # preserves the global-norm semantics under batch tiling.
    x_f32 = x.astype(jnp.float32)
    norm = jnp.sqrt(jnp.sum(jnp.square(x_f32))) + eps
    s = jnp.reshape(-scale.astype(jnp.float32) / norm, (1,))

    # Batch tiling: tile must be a multiple of 8 (sublane) and divide the
    # (padded) batch; zero-padded rows contribute zero output and are sliced off.
    blk = _round_up(min(block_b, _round_up(b, 8)), 8)
    bp = _round_up(b, blk)
    xp = x_f32 if bp == b else jnp.pad(x_f32, ((0, bp - b), (0, 0)))
    grid = (bp // blk,)

    flops = 2 * bp * c_in * c_out_p
    bytes_accessed = xp.size * 4 + w_padded.size * 2 + bp * c_out_p * 4

    out = pl.pallas_call(
        _hadamard_classifier_kernel,
        out_shape=jax.ShapeDtypeStruct((bp, c_out_p), jnp.float32),
        grid=grid,
        in_specs=[
            pl.BlockSpec(memory_space=pltpu.SMEM),              # fused scalar
            pl.BlockSpec((blk, c_in), lambda i: (i, 0)),        # x batch tile
            pl.BlockSpec((c_in, c_out_p), lambda i: (0, 0)),    # resident W
        ],
        out_specs=pl.BlockSpec((blk, c_out_p), lambda i: (i, 0)),
        compiler_params=pltpu.CompilerParams(
            dimension_semantics=("parallel",),      # shards batch across TCs (v7x)
            vmem_limit_bytes=48 * 1024 * 1024,      # headroom, still < v7x 64 MiB
        ),
        cost_estimate=pl.CostEstimate(
            flops=flops, transcendentals=0, bytes_accessed=bytes_accessed),
    )(s, xp, w_padded)

    return out[:b, :out_channels]


def _reference(x, proj, scale, out_channels, eps=1e-8):
    norm = jnp.sqrt(jnp.sum(jnp.square(x.astype(jnp.float32)))) + eps
    out = (x / norm) @ proj[:out_channels, :x.shape[1]].T
    return -scale * out


if __name__ == "__main__":
    # Small deterministic example consistent with the module's forward:
    # classifier input is (batch, in_channels).
    batch = 8
    in_channels = 32
    out_channels = 16

    sz = 2 ** int(math.ceil(math.log(max(in_channels, out_channels), 2)))
    proj = _hadamard_matrix(sz)                     # registered buffer 'proj'
    scale = jnp.float32(1.0 / math.sqrt(out_channels))  # nn.Parameter 'scale'

    key = jax.random.PRNGKey(0)
    x = jax.random.normal(key, (batch, in_channels), dtype=jnp.float32)

    # Weight prep hoisted out of the per-call path (done once per model).
    w_padded = prepare_hadamard_weight(proj, in_channels, out_channels)

    fwd = jax.jit(functools.partial(hadamard_classifier,
                                    out_channels=out_channels))
    out = fwd(x, w_padded, scale)
    out = jax.block_until_ready(out)

    ref = _reference(x, proj, scale, out_channels)
    assert out.shape == (batch, out_channels)
    assert jnp.allclose(out, ref, atol=1e-5, rtol=1e-5), "mismatch vs reference"

    # TODO(synk): IntQuantTensor metadata propagation (output scale/zero-point/
    # bit-width bookkeeping) has no tensor-compute equivalent; only the value
    # path is implemented.
    print("KERNEL_OK")
</pallas_src>

<mosaic_0001>
module attributes {stable_mosaic.version = 11 : i64} {
  func.func @_hadamard_classifier_kernel(%arg0: i32, %arg1: memref<1xf32, #tpu.memory_space<smem>>, %arg2: memref<8x32xf32, #tpu.memory_space<vmem>>, %arg3: memref<32x128xbf16, #tpu.memory_space<vmem>>, %arg4: memref<8x128xf32, #tpu.memory_space<vmem>>) attributes {dimension_semantics = [#tpu.dimension_semantics<parallel>], iteration_bounds = array<i64: 1>, scalar_prefetch = 0 : i64, scratch_operands = 0 : i64, tpu.core_type = #tpu.core_type<tc>, window_params = [{transform_indices = @transform_0, window_bounds = array<i64: 1>}, {transform_indices = @transform_1, window_bounds = array<i64: 8, 32>}, {pipeline_mode = #tpu.pipeline_mode<synchronous>, transform_indices = @transform_2, window_bounds = array<i64: 32, 128>}, {transform_indices = @transform_3, window_bounds = array<i64: 8, 128>}]} {
    %c0 = arith.constant 0 : index
    %c0_0 = arith.constant 0 : index
    %0 = vector.load %arg2[%c0, %c0_0] : memref<8x32xf32, #tpu.memory_space<vmem>>, vector<8x32xf32>
    %c0_1 = arith.constant 0 : index
    %c0_2 = arith.constant 0 : index
    %1 = vector.load %arg3[%c0_1, %c0_2] : memref<32x128xbf16, #tpu.memory_space<vmem>>, vector<32x128xbf16>
    %2 = arith.extf %1 : vector<32x128xbf16> to vector<32x128xf32>
    %cst = arith.constant dense<0.000000e+00> : vector<8x128xf32>
    %3 = tpu.matmul %0, %2, %cst {dimension_numbers = #tpu.dot_dimension_numbers<[1], [0], [0], [1], [0, 0, 1, 1], [], []>} : vector<8x32xf32>, vector<32x128xf32>, vector<8x128xf32> -> vector<8x128xf32>
    %c0_3 = arith.constant 0 : index
    %4 = memref.load %arg1[%c0_3] : memref<1xf32, #tpu.memory_space<smem>>
    %5 = vector.broadcast %4 : f32 to vector<8x128xf32>
    %6 = arith.mulf %5, %3 : vector<8x128xf32>
    %c0_4 = arith.constant 0 : index
    %c0_5 = arith.constant 0 : index
    %7 = vector.load %arg4[%c0_4, %c0_5] : memref<8x128xf32, #tpu.memory_space<vmem>>, vector<8x128xf32>
    tpu.vector_store %arg4[%c0_4, %c0_5], %6 {strides = array<i32>} : memref<8x128xf32, #tpu.memory_space<vmem>>, vector<8x128xf32>,
    return
  }
  func.func @transform_0(%arg0: i32) -> i32 {
    %c0_i32 = arith.constant 0 : i32
    %c0_i32_0 = arith.constant 0 : i32
    return %c0_i32 : i32
  }
  func.func @transform_1(%arg0: i32) -> (i32, i32) {
    %c0_i32 = arith.constant 0 : i32
    %c0_i32_0 = arith.constant 0 : i32
    return %arg0, %c0_i32 : i32, i32
  }
  func.func @transform_2(%arg0: i32) -> (i32, i32) {
    %c0_i32 = arith.constant 0 : i32
    %c0_i32_0 = arith.constant 0 : i32
    %c0_i32_1 = arith.constant 0 : i32
    return %c0_i32, %c0_i32_0 : i32, i32
  }
  func.func @transform_3(%arg0: i32) -> (i32, i32) {
    %c0_i32 = arith.constant 0 : i32
    %c0_i32_0 = arith.constant 0 : i32
    return %arg0, %c0_i32 : i32, i32
  }
}

</mosaic_0001>

<bundles_post_ra>
// kernel: hadamard_classifier.1
= control target key start
LH: loop header
LB: loop body
LE: loop exit
PB: predicated region body
PF: predicated region fallthrough
CT: control target
= control target key end

     0   :  { %v177_v1 = vmov 0.0|0.0   ;;  %vm178_vm0 = vmmov 0   ;;  %v179_v2 = vmov 0.0   ;;  %s225_s0 = inlined_call_operand.<no memory space> [shape: f32[1], index: 0, kind: input, shape index: {}]   ;;  %s226_s1 = inlined_call_operand.vmem [shape: f32[8,32], index: 1, kind: input, shape index: {}]   ;;  %s227_s2 = inlined_call_operand.vmem [shape: bf16[32,128], index: 2, kind: input, shape index: {}]   ;;  %s228_s3 = inlined_call_operand.hbm [shape: f32[8,128], index: 3, kind: output, shape index: {}]  }
   0x1   :  { %v119_v0 = vld [vmem:[%s227_s2] sm:$0xff]   ;;  %143 = vmatprep.subr.bf16.mxu0 %v177_v1  ;;  %140 = vmatprep.mubr.msk.f32.mxu0 %vm178_vm0, %v179_v2 }
   0x2   :  { %9 = vsyncpa [#allocation4], 0  ;;  %145 = vmatpush3.bf16.msra.mxu0 %v119_v0  ;;  %v126_v3 = vld [vmem:[%s227_s2 + $0x8] sm:$0xff]   ;;  %v16_v4 = vld [vmem:[%s226_s1] sm:$0xff]  ;;  %vm25_vm1 = vcmask 261120   ;;  %v100_v5 = vstv %s225_s0  ;;  %s180_s20 = smov [#allocation3]  }
   0x3   :  { %146 = vmatprep.subr.bf16.mxu0 %v177_v1  ;;  %s109_s21 = sshll.u32 %s180_s20, 4  ;;  %s110_s21 = int_to_ptr.vmem [resolvable:$true] %s109_s21 }
   0x4   :  { %s153_s22 = scalar_lea.vmem %s110_s21, 128  ;;  %p158_p1 = scmp.lt.s32.totalorder %s110_s21, %s110_s21 }
   0x5   :  { %p154_p0 = scmp.ne.s32.totalorder %s110_s21, %s153_s22  ;;  %p159_p2 = scmp.lt.s32.totalorder %s153_s22, %s153_s22 }
   0x6   :  { %148 = vmatpush3.bf16.msra.mxu0 %v126_v3 }
   0x7   :  { %p160_p3 = por %p159_p2, %p158_p1 }
   0x9   :  { %141 = vmatmul.mubr.msk.f32.vlgmr.msra.gmra.mrb[0].mxu0 %vm25_vm1, %v16_v4  ;;  %p161_p4 = pnand %p160_p3, %p154_p0 }
  0xdc   :  { %v95_v6 = vpop.f32.mrb[0].mxu0 }
  0xdd   :  { %v101_v7 = vmul.f32 %v100_v5, %v95_v6  ;;  %v142_v8 = vpop.f32.mrb[1].mxu0 }
  0xdf   :  { %102 = vst [vmem:[#allocation3] sm:$0xff] %v101_v7 }
  0xe0   :  { %164 = shalt.err (!%p161_p4)
}
  0xe1   :  { %s165_s23 = scalar_lea.hbm %s228_s3, 128 }
  0xe2   :  { %p166_p5 = scmp.ne.s32.totalorder %s228_s3, %s165_s23  ;;  %p169_p6 = scmp.lt.u32.totalorder %s165_s23, %s228_s3 }
  0xe4   :  { %p171_p7 = pnand %p169_p6, %p166_p5 }
  0xe6   :  { %174 = shalt.err (!%p171_p7)
}
  0xe7   :  { %112 = dma.vmem_to_hbm [thread:$0]  %s110_s21, 128, %s228_s3, [#allocation4]  }
  0xe8   :  { %175 = dma.done.wait [#allocation4], 128  }
  0xe9   :  { %176 = vsyncadd [#allocation4], 4294967168 }
  0xea   :  { %116 = vsyncpa [#allocation4], 1 }

</bundles_post_ra>
